<compile_context>
chip_gen: v7x
topology: tpu7x:2x2x1
jax: 0.10.0
libtpu: 0.0.40
codegen_flags: <defaults>
</compile_context>

<pallas_src>
import jax
import jax.numpy as jnp
from jax.experimental import pallas as pl
from jax.experimental.pallas import tpu as pltpu

NUM_CLASSES = 21
IN_FEATURES = 256
HIDDEN = 256
OUT_PAD = 128     # lane-dense padded output width (>= NUM_CLASSES, multiple of 128)
ROW_PAD = 8       # sublane alignment for the row (batch) dimension
MAX_TILE_M = 256  # row tile when the batch is large enough to fill MXU rows


def _round_up(n, m):
    return ((n + m - 1) // m) * m


def _head_kernel(x_ref, w1_ref, b1_ref, w2_ref, b2_ref, o_ref):
    # x_ref : (tile_m, 256) bf16      w1_ref: (256, 256)  bf16
    # b1_ref: (1, 256)      f32       w2_ref: (256, 128)  bf16 (cols >= 21 are zero)
    # b2_ref: (1, 128)      f32       o_ref : (tile_m, 128) f32
    # Layer 1: bf16 operands on the MXU, f32 accumulation.
    h = jnp.dot(x_ref[...], w1_ref[...], preferred_element_type=jnp.float32)
    h = jnp.maximum(h + b1_ref[...], 0.0)            # bias + ReLU in f32 (VPU)
    # Layer 2: cast the small activation down to bf16 (cheap) and keep w2 in bf16.
    out = jnp.dot(h.astype(jnp.bfloat16), w2_ref[...],
                  preferred_element_type=jnp.float32)
    o_ref[...] = out + b2_ref[...]


def prepare_params(w1, b1, w2, b2):
    """One-time (out-of-hot-path) parameter massaging: casts, reshapes, lane padding.

    w1: (256, 256) stored (in, out) so the kernel computes x @ w1 (== x @ W_pt.T)
    b1: (256,)   w2: (256, 21)   b2: (21,)
    """
    w1_p = w1.astype(jnp.bfloat16)
    b1_p = b1.reshape(1, HIDDEN).astype(jnp.float32)
    w2_p = jnp.zeros((HIDDEN, OUT_PAD), jnp.bfloat16).at[:, :NUM_CLASSES].set(
        w2.astype(jnp.bfloat16))
    b2_p = jnp.zeros((1, OUT_PAD), jnp.float32).at[0, :NUM_CLASSES].set(
        b2.astype(jnp.float32))
    return jax.device_put((w1_p, b1_p, w2_p, b2_p))


@jax.jit
def object_detection_head(x_nchw, w1_p, b1_p, w2_p, b2_p):
    """Forward pass equivalent to the PyTorch module (weights pre-prepared).

    x_nchw: (B, C, H, W) with C*H*W == 256.  Returns (B, 21) float32.
    """
    B = x_nchw.shape[0]
    x_flat = jnp.reshape(x_nchw, (B, -1))  # same order as torch .view(B, -1) on NCHW
    assert x_flat.shape[1] == IN_FEATURES, "flattened feature dim must be 256"

    # Row tiling: single 8-aligned tile for small batches, 256-row tiles (fills MXU
    # rows on v6e/v7x, 2x128 on v5e) with a parallel grid for large batches.
    if B <= MAX_TILE_M:
        tile_m = _round_up(B, ROW_PAD)
    else:
        tile_m = MAX_TILE_M
    rows = _round_up(B, tile_m)
    num_tiles = rows // tile_m

    x_pad = jnp.zeros((rows, IN_FEATURES), jnp.bfloat16).at[:B].set(
        x_flat.astype(jnp.bfloat16))

    cost = pl.CostEstimate(
        flops=2 * rows * IN_FEATURES * (HIDDEN + OUT_PAD),
        transcendentals=0,
        bytes_accessed=(x_pad.size * 2 + w1_p.size * 2 + w2_p.size * 2
                        + b1_p.size * 4 + b2_p.size * 4 + rows * OUT_PAD * 4),
    )

    out = pl.pallas_call(
        _head_kernel,
        out_shape=jax.ShapeDtypeStruct((rows, OUT_PAD), jnp.float32),
        grid=(num_tiles,),
        in_specs=[
            pl.BlockSpec((tile_m, IN_FEATURES), lambda i: (i, 0)),   # x: gridded rows
            pl.BlockSpec((IN_FEATURES, HIDDEN), lambda i: (0, 0)),   # w1: VMEM-resident
            pl.BlockSpec((1, HIDDEN),           lambda i: (0, 0)),   # b1
            pl.BlockSpec((HIDDEN, OUT_PAD),     lambda i: (0, 0)),   # w2: VMEM-resident
            pl.BlockSpec((1, OUT_PAD),          lambda i: (0, 0)),   # b2
        ],
        out_specs=pl.BlockSpec((tile_m, OUT_PAD), lambda i: (i, 0)),
        compiler_params=pltpu.CompilerParams(
            dimension_semantics=("parallel",)),                       # v7x: 2 TCs
        cost_estimate=cost,
    )(x_pad, w1_p, b1_p, w2_p, b2_p)
    return out[:B, :NUM_CLASSES]


def init_params(key):
    """Deterministic PyTorch-Linear-style uniform init: U(-1/sqrt(fan_in), 1/sqrt(fan_in))."""
    k1, k2, k3, k4 = jax.random.split(key, 4)
    bound1 = 1.0 / jnp.sqrt(jnp.float32(IN_FEATURES))
    bound2 = 1.0 / jnp.sqrt(jnp.float32(HIDDEN))
    w1 = jax.random.uniform(k1, (IN_FEATURES, HIDDEN), jnp.float32, -bound1, bound1)
    b1 = jax.random.uniform(k2, (HIDDEN,), jnp.float32, -bound1, bound1)
    w2 = jax.random.uniform(k3, (HIDDEN, NUM_CLASSES), jnp.float32, -bound2, bound2)
    b2 = jax.random.uniform(k4, (NUM_CLASSES,), jnp.float32, -bound2, bound2)
    return w1, b1, w2, b2


def _reference(x, w1, b1, w2, b2, quantized):
    """Reference forward.  quantized=True mirrors the kernel's bf16 operand rounding."""
    x_flat = x.reshape(x.shape[0], -1)
    if not quantized:
        return jnp.maximum(x_flat @ w1 + b1, 0.0) @ w2 + b2
    q = lambda a: a.astype(jnp.bfloat16).astype(jnp.float32)
    h = jnp.maximum(q(x_flat) @ q(w1) + b1, 0.0)
    return q(h) @ q(w2) + b2


if __name__ == "__main__":
    key = jax.random.PRNGKey(0)
    k_x, k_p, k_big = jax.random.split(key, 3)

    # (B, C, H, W) with C*H*W = 4*8*8 = 256, matching the fc input of 256.
    x = jax.random.normal(k_x, (2, 4, 8, 8), dtype=jnp.float32)
    w1, b1, w2, b2 = init_params(k_p)
    params = prepare_params(w1, b1, w2, b2)          # one-time, outside hot path

    # Small-batch path (single tile).
    out = jax.block_until_ready(object_detection_head(x, *params))
    assert out.shape == (2, NUM_CLASSES)
    ref_q = _reference(x, w1, b1, w2, b2, quantized=True)
    ref_f32 = _reference(x, w1, b1, w2, b2, quantized=False)
    assert jnp.allclose(out, ref_q, atol=1e-3, rtol=1e-3)
    assert jnp.allclose(out, ref_f32, atol=2.5e-2, rtol=2.5e-2)

    # Large-batch path (gridded rows, parallel axis, VMEM-resident weights).
    x_big = jax.random.normal(k_big, (512, 4, 8, 8), dtype=jnp.float32)
    out_big = jax.block_until_ready(object_detection_head(x_big, *params))
    assert out_big.shape == (512, NUM_CLASSES)
    ref_big = _reference(x_big, w1, b1, w2, b2, quantized=True)
    assert jnp.allclose(out_big, ref_big, atol=1e-3, rtol=1e-3)

    print("KERNEL_OK")
</pallas_src>

<mosaic_0001>
module attributes {stable_mosaic.version = 11 : i64} {
  func.func @_head_kernel(%arg0: i32, %arg1: memref<8x256xbf16, #tpu.memory_space<vmem>>, %arg2: memref<256x256xbf16, #tpu.memory_space<vmem>>, %arg3: memref<1x256xf32, #tpu.memory_space<vmem>>, %arg4: memref<256x128xbf16, #tpu.memory_space<vmem>>, %arg5: memref<1x128xf32, #tpu.memory_space<vmem>>, %arg6: memref<8x128xf32, #tpu.memory_space<vmem>>) attributes {dimension_semantics = [#tpu.dimension_semantics<parallel>], iteration_bounds = array<i64: 1>, scalar_prefetch = 0 : i64, scratch_operands = 0 : i64, tpu.core_type = #tpu.core_type<tc>, window_params = [{transform_indices = @transform_0, window_bounds = array<i64: 8, 256>}, {pipeline_mode = #tpu.pipeline_mode<synchronous>, transform_indices = @transform_1, window_bounds = array<i64: 256, 256>}, {pipeline_mode = #tpu.pipeline_mode<synchronous>, transform_indices = @transform_2, window_bounds = array<i64: 1, 256>}, {pipeline_mode = #tpu.pipeline_mode<synchronous>, transform_indices = @transform_3, window_bounds = array<i64: 256, 128>}, {pipeline_mode = #tpu.pipeline_mode<synchronous>, transform_indices = @transform_4, window_bounds = array<i64: 1, 128>}, {transform_indices = @transform_5, window_bounds = array<i64: 8, 128>}]} {
    %c0 = arith.constant 0 : index
    %c0_0 = arith.constant 0 : index
    %0 = vector.load %arg1[%c0, %c0_0] : memref<8x256xbf16, #tpu.memory_space<vmem>>, vector<8x256xbf16>
    %c0_1 = arith.constant 0 : index
    %c0_2 = arith.constant 0 : index
    %1 = vector.load %arg2[%c0_1, %c0_2] : memref<256x256xbf16, #tpu.memory_space<vmem>>, vector<256x256xbf16>
    %cst = arith.constant dense<0.000000e+00> : vector<8x256xf32>
    %2 = tpu.matmul %0, %1, %cst {dimension_numbers = #tpu.dot_dimension_numbers<[1], [0], [0], [1], [0, 0, 1, 1], [], []>} : vector<8x256xbf16>, vector<256x256xbf16>, vector<8x256xf32> -> vector<8x256xf32>
    %c0_3 = arith.constant 0 : index
    %c0_4 = arith.constant 0 : index
    %3 = vector.load %arg3[%c0_3, %c0_4] : memref<1x256xf32, #tpu.memory_space<vmem>>, vector<1x256xf32>
    %4 = vector.broadcast %3 : vector<1x256xf32> to vector<8x256xf32>
    %5 = arith.addf %2, %4 : vector<8x256xf32>
    %cst_5 = arith.constant 0.000000e+00 : f32
    %6 = vector.broadcast %cst_5 : f32 to vector<8x256xf32>
    %7 = arith.maximumf %5, %6 : vector<8x256xf32>
    %8 = arith.truncf %7 : vector<8x256xf32> to vector<8x256xbf16>
    %c0_6 = arith.constant 0 : index
    %c0_7 = arith.constant 0 : index
    %9 = vector.load %arg4[%c0_6, %c0_7] : memref<256x128xbf16, #tpu.memory_space<vmem>>, vector<256x128xbf16>
    %cst_8 = arith.constant dense<0.000000e+00> : vector<8x128xf32>
    %10 = tpu.matmul %8, %9, %cst_8 {dimension_numbers = #tpu.dot_dimension_numbers<[1], [0], [0], [1], [0, 0, 1, 1], [], []>} : vector<8x256xbf16>, vector<256x128xbf16>, vector<8x128xf32> -> vector<8x128xf32>
    %c0_9 = arith.constant 0 : index
    %c0_10 = arith.constant 0 : index
    %11 = vector.load %arg5[%c0_9, %c0_10] : memref<1x128xf32, #tpu.memory_space<vmem>>, vector<1x128xf32>
    %12 = vector.broadcast %11 : vector<1x128xf32> to vector<8x128xf32>
    %13 = arith.addf %10, %12 : vector<8x128xf32>
    %c0_11 = arith.constant 0 : index
    %c0_12 = arith.constant 0 : index
    %14 = vector.load %arg6[%c0_11, %c0_12] : memref<8x128xf32, #tpu.memory_space<vmem>>, vector<8x128xf32>
    tpu.vector_store %arg6[%c0_11, %c0_12], %13 {strides = array<i32>} : memref<8x128xf32, #tpu.memory_space<vmem>>, vector<8x128xf32>,
    return
  }
  func.func @transform_0(%arg0: i32) -> (i32, i32) {
    %c0_i32 = arith.constant 0 : i32
    %c0_i32_0 = arith.constant 0 : i32
    return %arg0, %c0_i32 : i32, i32
  }
  func.func @transform_1(%arg0: i32) -> (i32, i32) {
    %c0_i32 = arith.constant 0 : i32
    %c0_i32_0 = arith.constant 0 : i32
    %c0_i32_1 = arith.constant 0 : i32
    return %c0_i32, %c0_i32_0 : i32, i32
  }
  func.func @transform_2(%arg0: i32) -> (i32, i32) {
    %c0_i32 = arith.constant 0 : i32
    %c0_i32_0 = arith.constant 0 : i32
    %c0_i32_1 = arith.constant 0 : i32
    return %c0_i32, %c0_i32_0 : i32, i32
  }
  func.func @transform_3(%arg0: i32) -> (i32, i32) {
    %c0_i32 = arith.constant 0 : i32
    %c0_i32_0 = arith.constant 0 : i32
    %c0_i32_1 = arith.constant 0 : i32
    return %c0_i32, %c0_i32_0 : i32, i32
  }
  func.func @transform_4(%arg0: i32) -> (i32, i32) {
    %c0_i32 = arith.constant 0 : i32
    %c0_i32_0 = arith.constant 0 : i32
    %c0_i32_1 = arith.constant 0 : i32
    return %c0_i32, %c0_i32_0 : i32, i32
  }
  func.func @transform_5(%arg0: i32) -> (i32, i32) {
    %c0_i32 = arith.constant 0 : i32
    %c0_i32_0 = arith.constant 0 : i32
    return %arg0, %c0_i32 : i32, i32
  }
}

</mosaic_0001>

<bundles_post_ra>
// kernel: object_detection_head.1
= control target key start
LH: loop header
LB: loop body
LE: loop exit
PB: predicated region body
PF: predicated region fallthrough
CT: control target
= control target key end

     0   :  { %10 = vsyncpa [#allocation3], 0  ;;  %s639_s18 = smov [#allocation2]   ;;  %s750_s0 = inlined_call_operand.vmem [shape: bf16[8,256], index: 0, kind: input, shape index: {}]   ;;  %s751_s1 = inlined_call_operand.hbm [shape: bf16[256,256], index: 1, kind: input, shape index: {}]   ;;  %s752_s2 = inlined_call_operand.vmem [shape: f32[1,256], index: 2, kind: input, shape index: {}]   ;;  %s753_s3 = inlined_call_operand.vmem [shape: bf16[256,128], index: 3, kind: input, shape index: {}]   ;;  %s754_s4 = inlined_call_operand.vmem [shape: f32[1,128], index: 4, kind: input, shape index: {}]   ;;  %s755_s5 = inlined_call_operand.vmem [shape: f32[8,128], index: 5, kind: output, shape index: {}]  }
   0x1   :  { %s18_s19 = sshll.u32 %s639_s18, 4  ;;  %s615_s22 = scalar_lea.hbm %s751_s1, 4096  ;;  %s19_s19 = int_to_ptr.vmem [resolvable:$true] %s18_s19 }
   0x2   :  { %p616_p0 = scmp.ne.s32.totalorder %s751_s1, %s615_s22  ;;  %p619_p1 = scmp.lt.u32.totalorder %s615_s22, %s751_s1 }
   0x4   :  { %p621_p2 = pnand %p619_p1, %p616_p0 }
   0x6   :  { %624 = shalt.err (!%p621_p2)
}
   0x7   :  { %s625_s27 = scalar_lea.vmem %s19_s19, 4096  ;;  %p630_p4 = scmp.lt.s32.totalorder %s19_s19, %s19_s19 }
   0x8   :  { %p626_p3 = scmp.ne.s32.totalorder %s19_s19, %s625_s27  ;;  %p631_p5 = scmp.lt.s32.totalorder %s625_s27, %s625_s27 }
   0xa   :  { %p632_p6 = por %p631_p5, %p630_p4 }
   0xc   :  { %p633_p7 = pnand %p632_p6, %p626_p3 }
   0xe   :  { %636 = shalt.err (!%p633_p7)
}
   0xf   :  { %s640_s28 = smov 128   ;;  %s641_s29 = smov 8  }
  0x10   :  { %24 = dma.hbm_to_vmem [thread:$0]  %s751_s1, 4096, %s19_s19, [#allocation3], %s640_s28, %s640_s28, %s641_s29  }
  0x11   :  { %637 = dma.done.wait [#allocation3], 4096  }
  0x12   :  { %638 = vsyncadd [#allocation3], 4294963200  ;;  %v549_v0 = vld [vmem:[#allocation2 + $0x4] ss:$8 sps:$4 sm:$0xff]   ;;  %v551_v1 = vld [vmem:[#allocation2] ss:$8 sps:$4 sm:$0xff]   ;;  %v70_v51 = vlaneseq }
  0x13   :  { %247 = vmatprep.subr.bf16.mxu0 %v549_v0  ;;  %v552_v2 = vld [vmem:[#allocation2 + $0x14] ss:$8 sps:$4 sm:$0xff]   ;;  %v554_v3 = vld [vmem:[#allocation2 + $0x10] ss:$8 sps:$4 sm:$0xff]   ;;  %v555_v4 = vld [vmem:[#allocation2 + $0x24] ss:$8 sps:$4 sm:$0xff]  }
  0x14   :  { %248 = vmatpush1.bf16.msra.mxu0 %v551_v1  ;;  %v557_v5 = vld [vmem:[#allocation2 + $0x20] ss:$8 sps:$4 sm:$0xff]   ;;  %v558_v6 = vld [vmem:[#allocation2 + $0x34] ss:$8 sps:$4 sm:$0xff]   ;;  %v560_v7 = vld [vmem:[#allocation2 + $0x30] ss:$8 sps:$4 sm:$0xff]  }
  0x15   :  { %249 = vmatprep.subr.bf16.mxu0 %v552_v2  ;;  %v561_v8 = vld [vmem:[#allocation2 + $0x44] ss:$8 sps:$4 sm:$0xff]   ;;  %v563_v9 = vld [vmem:[#allocation2 + $0x40] ss:$8 sps:$4 sm:$0xff]   ;;  %v564_v10 = vld [vmem:[#allocation2 + $0x54] ss:$8 sps:$4 sm:$0xff]  }
  0x16   :  { %v566_v11 = vld [vmem:[#allocation2 + $0x50] ss:$8 sps:$4 sm:$0xff]   ;;  %v567_v12 = vld [vmem:[#allocation2 + $0x64] ss:$8 sps:$4 sm:$0xff]   ;;  %v569_v13 = vld [vmem:[#allocation2 + $0x60] ss:$8 sps:$4 sm:$0xff]  }
  0x17   :  { %v687_v14 = vld [vmem:[%s750_s0] sm:$0xff]  ;;  %v570_v15 = vld [vmem:[#allocation2 + $0x74] ss:$8 sps:$4 sm:$0xff]   ;;  %v601_v19 = vld [vmem:[%s753_s3 + $0x48] sm:$0xff]   ;;  %v71_v52 = vshrl.u32 %v70_v51, 7 }
  0x18   :  { %250 = vmatpush1.bf16.msra.mxu0 %v554_v3  ;;  %v474_v16 = vcombine.high %v687_v14, %v687_v14  ;;  %v599_v17 = vld [vmem:[%s753_s3 + $0x40] sm:$0xff]   ;;  %v572_v20 = vld [vmem:[#allocation2 + $0x70] ss:$8 sps:$4 sm:$0xff]   ;;  %v602_v21 = vld [vmem:[%s753_s3 + $0x8] sm:$0xff]   ;;  %v473_v46 = vcombine.low %v687_v14, %v687_v14 }
  0x19   :  { %251 = vmatprep.subr.bf16.mxu0 %v555_v4  ;;  %v600_v18 = vld [vmem:[%s753_s3] sm:$0xff]   ;;  %524 = vmatprep.subr.bf16.mxu1 %v599_v17  ;;  %v603_v22 = vld [vmem:[%s753_s3 + $0x50] sm:$0xff]   ;;  %v605_v26 = vld [vmem:[%s753_s3 + $0x58] sm:$0xff]   ;;  %v72_v53 = vsub.s32 0, %v71_v52  ;;  %v76_v55 = vsub.s32 1, %v71_v52 }
  0x1a   :  { %279 = vmatprep.mubr.bf16.mxu0 %v474_v16  ;;  %525 = vmatpush3.bf16.msra.mxu1 %v600_v18  ;;  %v573_v23 = vld [vmem:[#allocation2 + $0x84] ss:$8 sps:$4 sm:$0xff]   ;;  %v575_v24 = vld [vmem:[#allocation2 + $0x80] ss:$8 sps:$4 sm:$0xff]   ;;  %v604_v25 = vld [vmem:[%s753_s3 + $0x10] sm:$0xff]  }
  0x1b   :  { %526 = vmatprep.subr.bf16.mxu1 %v601_v19  ;;  %v576_v27 = vld [vmem:[#allocation2 + $0x94] ss:$8 sps:$4 sm:$0xff]   ;;  %v578_v28 = vld [vmem:[#allocation2 + $0x90] ss:$8 sps:$4 sm:$0xff]   ;;  %v607_v30 = vld [vmem:[%s753_s3 + $0x60] sm:$0xff]  }
  0x1c   :  { %252 = vmatpush1.bf16.msra.mxu0 %v557_v5  ;;  %v606_v29 = vld [vmem:[%s753_s3 + $0x18] sm:$0xff]   ;;  %v579_v31 = vld [vmem:[#allocation2 + $0xa4] ss:$8 sps:$4 sm:$0xff]   ;;  %v581_v33 = vld [vmem:[#allocation2 + $0xa0] ss:$8 sps:$4 sm:$0xff]  }
  0x1d   :  { %253 = vmatprep.subr.bf16.mxu0 %v558_v6  ;;  %v608_v32 = vld [vmem:[%s753_s3 + $0x20] sm:$0xff]   ;;  %v609_v34 = vld [vmem:[%s753_s3 + $0x68] sm:$0xff]   ;;  %v582_v35 = vld [vmem:[#allocation2 + $0xb4] ss:$8 sps:$4 sm:$0xff]  }
  0x1e   :  { %527 = vmatpush3.bf16.msra.mxu1 %v602_v21  ;;  %v610_v36 = vld [vmem:[%s753_s3 + $0x28] sm:$0xff]   ;;  %v584_v37 = vld [vmem:[#allocation2 + $0xb0] ss:$8 sps:$4 sm:$0xff]   ;;  %v588_v40 = vld [vmem:[#allocation2 + $0xd4] ss:$8 sps:$4 sm:$0xff]  }
  0x1f   :  { %528 = vmatprep.subr.bf16.mxu1 %v603_v22  ;;  %v585_v38 = vld [vmem:[#allocation2 + $0xc4] ss:$8 sps:$4 sm:$0xff]   ;;  %v587_v39 = vld [vmem:[#allocation2 + $0xc0] ss:$8 sps:$4 sm:$0xff]   ;;  %v590_v41 = vld [vmem:[#allocation2 + $0xd0] ss:$8 sps:$4 sm:$0xff]  }
  0x20   :  { %254 = vmatpush1.bf16.msra.mxu0 %v560_v7  ;;  %v591_v42 = vld [vmem:[#allocation2 + $0xe4] ss:$8 sps:$4 sm:$0xff]   ;;  %v593_v43 = vld [vmem:[#allocation2 + $0xe0] ss:$8 sps:$4 sm:$0xff]   ;;  %v594_v44 = vld [vmem:[#allocation2 + $0xf4] ss:$8 sps:$4 sm:$0xff]  }
  0x21   :  { %255 = vmatprep.subr.bf16.mxu0 %v561_v8  ;;  %v596_v45 = vld [vmem:[#allocation2 + $0xf0] ss:$8 sps:$4 sm:$0xff]   ;;  %v68_v54 = vld [vmem:[%s752_s2] sm:$0x3] }
  0x22   :  { %529 = vmatpush3.bf16.msra.mxu1 %v604_v25  ;;  %v611_v47 = vld [vmem:[%s753_s3 + $0x70] sm:$0xff]   ;;  %v613_v49 = vld [vmem:[%s753_s3 + $0x78] sm:$0xff]   ;;  %v73_v56 = vrot.slane %v68_v54, %v72_v53  ;;  %v77_v57 = vrot.slane %v68_v54, %v76_v55  ;;  %v507_v5 = vld [vmem:[%s754_s4] ss:$0 sm:$0xff] }
  0x23   :  { %530 = vmatprep.subr.bf16.mxu1 %v605_v26  ;;  %v612_v48 = vld [vmem:[%s753_s3 + $0x30] sm:$0xff]   ;;  %v614_v50 = vld [vmem:[%s753_s3 + $0x38] sm:$0xff]  }
  0x24   :  { %256 = vmatpush1.bf16.msra.mxu0 %v563_v9 }
  0x25   :  { %257 = vmatprep.subr.bf16.mxu0 %v564_v10 }
  0x26   :  { %531 = vmatpush3.bf16.msra.mxu1 %v606_v29 }
  0x27   :  { %532 = vmatprep.subr.bf16.mxu1 %v607_v30 }
  0x28   :  { %258 = vmatpush1.bf16.msra.mxu0 %v566_v11 }
  0x29   :  { %259 = vmatprep.subr.bf16.mxu0 %v567_v12 }
  0x2a   :  { %533 = vmatpush3.bf16.msra.mxu1 %v608_v32 }
  0x2b   :  { %534 = vmatprep.subr.bf16.mxu1 %v609_v34 }
  0x2c   :  { %260 = vmatpush1.bf16.msra.mxu0 %v569_v13 }
  0x2d   :  { %261 = vmatprep.subr.bf16.mxu0 %v570_v15 }
  0x2e   :  { %535 = vmatpush3.bf16.msra.mxu1 %v610_v36 }
  0x2f   :  { %536 = vmatprep.subr.bf16.mxu1 %v611_v47 }
  0x30   :  { %262 = vmatpush1.bf16.msra.mxu0 %v572_v20 }
  0x31   :  { %263 = vmatprep.subr.bf16.mxu0 %v573_v23 }
  0x32   :  { %537 = vmatpush3.bf16.msra.mxu1 %v612_v48 }
  0x33   :  { %538 = vmatprep.subr.bf16.mxu1 %v613_v49 }
  0x34   :  { %264 = vmatpush1.bf16.msra.mxu0 %v575_v24 }
  0x35   :  { %265 = vmatprep.subr.bf16.mxu0 %v576_v27 }
  0x36   :  { %539 = vmatpush3.bf16.msra.mxu1 %v614_v50 }
  0x38   :  { %266 = vmatpush1.bf16.msra.mxu0 %v578_v28 }
  0x39   :  { %267 = vmatprep.subr.bf16.mxu0 %v579_v31 }
  0x3c   :  { %268 = vmatpush1.bf16.msra.mxu0 %v581_v33 }
  0x3d   :  { %269 = vmatprep.subr.bf16.mxu0 %v582_v35 }
  0x40   :  { %270 = vmatpush1.bf16.msra.mxu0 %v584_v37 }
  0x41   :  { %271 = vmatprep.subr.bf16.mxu0 %v585_v38 }
  0x44   :  { %272 = vmatpush1.bf16.msra.mxu0 %v587_v39 }
  0x45   :  { %273 = vmatprep.subr.bf16.mxu0 %v588_v40 }
  0x48   :  { %274 = vmatpush1.bf16.msra.mxu0 %v590_v41 }
  0x49   :  { %275 = vmatprep.subr.bf16.mxu0 %v591_v42 }
  0x4c   :  { %276 = vmatpush1.bf16.msra.mxu0 %v593_v43 }
  0x4d   :  { %277 = vmatprep.subr.bf16.mxu0 %v594_v44 }
  0x50   :  { %278 = vmatpush1.bf16.msra.mxu0 %v596_v45 }
  0x53   :  { %280 = vmatmul.mubr.bf16.vlgmr.msra.gmra.mrb[0].mxu0 %v473_v46 }
 0x126   :  { %v281_v58 = vpop.f32.mrb[0].mxu0 }
 0x127   :  { %v282_v59 = vadd.f32 %v281_v58, %v73_v56  ;;  %v283_v60 = vpop.f32.mrb[1].mxu0 }
 0x128   :  { %v284_v61 = vadd.f32 %v283_v60, %v77_v57  ;;  %v285_v62 = vpop.f32.mrb[2].mxu0 }
 0x129   :  { %v288_v63 = vmax.f32 %v282_v59, 0.0  ;;  %v286_v0 = vpop.f32.mrb[3].mxu0 }
 0x12a   :  { %v289_v1 = vmax.f32 %v284_v61, 0.0 }
 0x12b   :  { %v290_v3 = vpack.c.bf16 %v288_v63, %v288_v63 }
 0x12c   :  { %v291_v2 = vpack.c.bf16 %v289_v1, %v289_v1 }
 0x12e   :  { %459 = vmatprep.mubr.bf16.mxu1 %v291_v2 }
 0x12f   :  { %460 = vmatmul.mubr.bf16.vlgmr.msra.gmra.mrb[0].mxu1 %v290_v3 }
 0x202   :  { %v540_v4 = vpop.f32.mrb[0].mxu1 }
 0x203   :  { %v541_v6 = vpop.f32.mrb[1].mxu1 }
 0x204   :  { %v542_v7 = vadd.f32 %v541_v6, %v540_v4  ;;  %v543_v8 = vpop.f32.mrb[2].mxu1 }
 0x205   :  { %v544_v9 = vpop.f32.mrb[3].mxu1 }
 0x206   :  { %v462_v10 = vadd.f32 %v542_v7, %v507_v5 }
 0x208   :  { %467 = vst [vmem:[%s755_s5] sm:$0xff] %v462_v10 }
 0x209   :  { %472 = vsyncpa [#allocation3], 1 }

</bundles_post_ra>
